<compile_context>
chip_gen: v6e
topology: v6e:2x2x1
jax: 0.10.0
libtpu: 0.0.40
codegen_flags: <defaults>
</compile_context>

<pallas_src>
from typing import NamedTuple

import jax
import jax.numpy as jnp
from jax.experimental import pallas as pl
from jax.experimental.pallas import tpu as pltpu


class NormalDist(NamedTuple):
    """Stand-in for torch.distributions.Normal — holds loc / scale."""
    loc: jax.Array
    scale: jax.Array


class PackedParams(NamedTuple):
    """Fused critic+actor weights, packed once (not per forward call)."""
    w1: jax.Array   # [in, 2*HP]      bf16
    b1: jax.Array   # [1, 2*HP]       f32
    w2: jax.Array   # [2*HP, 2*HP]    bf16 (block-diagonal)
    b2: jax.Array   # [1, 2*HP]       f32
    w3: jax.Array   # [2*HP, out_w]   bf16
    b3: jax.Array   # [1, out_w]      f32
    mask: jax.Array  # [1, out_w]     f32, 1.0 at column 0 (value), else 0.0
    num_actions: int


def _round_up(x: int, m: int) -> int:
    return ((x + m - 1) // m) * m


def _actor_critic_kernel(x_ref, w1_ref, b1_ref, w2_ref, b2_ref, w3_ref, b3_ref,
                         mask_ref, out_ref):
    x = x_ref[...]                                              # (TB, in) bf16

    # Fused critic+actor chain: Linear -> ReLU -> Linear -> ReLU -> Linear.
    # bf16 operands on the MXU, f32 accumulation, f32 bias/epilogue.
    h = jnp.dot(x, w1_ref[...], preferred_element_type=jnp.float32) + b1_ref[...]
    h = jnp.maximum(h, 0.0).astype(jnp.bfloat16)
    h = jnp.dot(h, w2_ref[...], preferred_element_type=jnp.float32) + b2_ref[...]
    h = jnp.maximum(h, 0.0).astype(jnp.bfloat16)
    y = jnp.dot(h, w3_ref[...], preferred_element_type=jnp.float32) + b3_ref[...]

    # Column 0 is the critic value (no tanh); every other column is an actor
    # output (tanh).  mask is a resident (1, out_w) 0/1 vector — no per-step
    # iota/compare.  Padded columns are exactly 0 -> tanh(0) = 0, harmless.
    t = jnp.tanh(y)
    out = t + mask_ref[...] * (y - t)
    out_ref[...] = out.astype(out_ref.dtype)


def pack_params(params) -> PackedParams:
    """Pack critic/actor weights into one fused, lane-dense 3-layer MLP.

    Hidden width per branch is zero-padded to a multiple of 64 so the fused
    hidden dimension (2*HP) is a multiple of 128 (lane-dense, MXU aligned).
    Call this ONCE (at init / after each optimizer step), not per forward.
    """
    in_dim, H = params["cw1"].shape
    A = params["aw3"].shape[1]
    HP = _round_up(H, 64)                 # padded hidden per branch (2*HP % 128 == 0)
    out_w = _round_up(1 + A, 128)         # lane-dense output slab width

    w1 = jnp.zeros((in_dim, 2 * HP), jnp.float32)
    w1 = w1.at[:, 0:H].set(params["cw1"]).at[:, HP:HP + H].set(params["aw1"])
    b1 = jnp.zeros((1, 2 * HP), jnp.float32)
    b1 = b1.at[:, 0:H].set(params["cb1"]).at[:, HP:HP + H].set(params["ab1"])

    w2 = jnp.zeros((2 * HP, 2 * HP), jnp.float32)
    w2 = w2.at[0:H, 0:H].set(params["cw2"]).at[HP:HP + H, HP:HP + H].set(params["aw2"])
    b2 = jnp.zeros((1, 2 * HP), jnp.float32)
    b2 = b2.at[:, 0:H].set(params["cb2"]).at[:, HP:HP + H].set(params["ab2"])

    w3 = jnp.zeros((2 * HP, out_w), jnp.float32)
    w3 = w3.at[0:H, 0:1].set(params["cw3"]).at[HP:HP + H, 1:1 + A].set(params["aw3"])
    b3 = jnp.zeros((1, out_w), jnp.float32)
    b3 = b3.at[:, 0:1].set(params["cb3"]).at[:, 1:1 + A].set(params["ab3"])

    mask = jnp.zeros((1, out_w), jnp.float32).at[:, 0].set(1.0)

    return PackedParams(
        w1=w1.astype(jnp.bfloat16), b1=b1,
        w2=w2.astype(jnp.bfloat16), b2=b2,
        w3=w3.astype(jnp.bfloat16), b3=b3,
        mask=mask, num_actions=A,
    )


def actor_critic_forward(x, packed: PackedParams, action_std):
    """Fused actor-critic forward. Returns (NormalDist(mu, std), value)."""
    B, num_inputs = x.shape
    A = packed.num_actions
    H2 = packed.w1.shape[1]
    out_w = packed.w3.shape[1]

    # Batch tile: multiple of 8 (sublane), large enough to amortise per-step
    # overhead, and cdiv(B, 2) keeps grid >= 2 steps so v7x's two TensorCores
    # both get work on the "parallel" batch axis.  Per-step VMEM at TB=2048 is
    # ~2.5 MiB with double-buffering — far under every generation's limit.
    TB = min(2048, _round_up(pl.cdiv(B, 2), 8))
    B_pad = _round_up(B, TB)
    x_p = jnp.pad(x, ((0, B_pad - B), (0, 0))) if B_pad != B else x
    x_p = x_p.astype(jnp.bfloat16)
    grid = (B_pad // TB,)

    resident_ops = (packed.w1, packed.b1, packed.w2, packed.b2,
                    packed.w3, packed.b3, packed.mask)
    in_specs = [pl.BlockSpec((TB, num_inputs), lambda i: (i, 0))]
    # Constant (0, 0) index_map -> weights stay resident in VMEM across steps.
    in_specs += [pl.BlockSpec(op.shape, lambda i: (0, 0)) for op in resident_ops]

    flops = 2 * B_pad * (num_inputs * H2 + H2 * H2 + H2 * out_w)
    bytes_accessed = (
        2 * x_p.size                                            # bf16 input
        + 2 * (packed.w1.size + packed.w2.size + packed.w3.size)  # bf16 weights
        + 4 * (packed.b1.size + packed.b2.size + packed.b3.size + packed.mask.size)
        + 4 * B_pad * out_w                                     # f32 output slab
    )
    cost = pl.CostEstimate(
        flops=flops,
        transcendentals=B_pad * out_w,   # tanh on the output slab
        bytes_accessed=bytes_accessed,
    )

    out = pl.pallas_call(
        _actor_critic_kernel,
        out_shape=jax.ShapeDtypeStruct((B_pad, out_w), jnp.float32),
        grid=grid,
        in_specs=in_specs,
        out_specs=pl.BlockSpec((TB, out_w), lambda i: (i, 0)),
        compiler_params=pltpu.CompilerParams(
            dimension_semantics=("parallel",),
        ),
        cost_estimate=cost,
    )(x_p, *resident_ops)

    value = out[:B, 0:1]
    mu = out[:B, 1:1 + A]
    std = jnp.full_like(mu, action_std)   # torch.tensor([std]).expand_as(mu)
    return NormalDist(loc=mu, scale=std), value


def init_params(key, num_inputs, num_outputs, hidden_size):
    """Matches init_weights: weight ~ N(0, 0.1), bias = 0.1.

    Weights stored as [in, out] (transposed vs. nn.Linear) so kernel does x @ W.
    Biases stored as [1, out] for clean broadcasting inside the kernel.
    """
    keys = jax.random.split(key, 6)

    def lin(k, din, dout):
        w = 0.1 * jax.random.normal(k, (din, dout), dtype=jnp.float32)
        b = jnp.full((1, dout), 0.1, dtype=jnp.float32)
        return w, b

    cw1, cb1 = lin(keys[0], num_inputs, hidden_size)
    cw2, cb2 = lin(keys[1], hidden_size, hidden_size)
    cw3, cb3 = lin(keys[2], hidden_size, 1)
    aw1, ab1 = lin(keys[3], num_inputs, hidden_size)
    aw2, ab2 = lin(keys[4], hidden_size, hidden_size)
    aw3, ab3 = lin(keys[5], num_inputs if False else hidden_size, num_outputs)

    return dict(
        cw1=cw1, cb1=cb1, cw2=cw2, cb2=cb2, cw3=cw3, cb3=cb3,
        aw1=aw1, ab1=ab1, aw2=aw2, ab2=ab2, aw3=aw3, ab3=ab3,
    )


def reference_forward(x, params, action_std):
    """Pure-JAX f32 reference (mirrors the PyTorch module) for correctness."""
    relu = lambda z: jnp.maximum(z, 0.0)
    h = relu(x @ params["cw1"] + params["cb1"])
    h = relu(h @ params["cw2"] + params["cb2"])
    value = h @ params["cw3"] + params["cb3"]
    a = relu(x @ params["aw1"] + params["ab1"])
    a = relu(a @ params["aw2"] + params["ab2"])
    mu = jnp.tanh(a @ params["aw3"] + params["ab3"])
    std = jnp.full_like(mu, action_std)
    return mu, std, value


if __name__ == "__main__":
    # Small shapes consistent with the module: an MLP over flat observations.
    batch = 16
    num_inputs = 16
    num_outputs = 4
    hidden_size = 32
    action_std = 0.5

    key = jax.random.PRNGKey(0)
    k_params, k_x = jax.random.split(key)

    params = init_params(k_params, num_inputs, num_outputs, hidden_size)
    packed = pack_params(params)   # hoisted: pack once, reuse every forward
    x = jax.random.normal(k_x, (batch, num_inputs), dtype=jnp.float32)

    dist, value = actor_critic_forward(x, packed, action_std)
    jax.block_until_ready((dist.loc, dist.scale, value))

    mu_ref, std_ref, value_ref = reference_forward(x, params, action_std)
    assert dist.loc.shape == (batch, num_outputs)
    assert dist.scale.shape == (batch, num_outputs)
    assert value.shape == (batch, 1)
    # bf16 operands (f32 accumulation) -> slightly relaxed tolerance vs f32 ref.
    assert jnp.allclose(dist.loc, mu_ref, atol=3e-2, rtol=3e-2)
    assert jnp.allclose(dist.scale, std_ref)
    assert jnp.allclose(value, value_ref, atol=3e-2, rtol=3e-2)

    print("KERNEL_OK")
</pallas_src>

<mosaic_0001>
module attributes {stable_mosaic.version = 11 : i64} {
  func.func @_actor_critic_kernel(%arg0: i32, %arg1: memref<8x16xbf16, #tpu.memory_space<vmem>>, %arg2: memref<16x128xbf16, #tpu.memory_space<vmem>>, %arg3: memref<1x128xf32, #tpu.memory_space<vmem>>, %arg4: memref<128x128xbf16, #tpu.memory_space<vmem>>, %arg5: memref<1x128xf32, #tpu.memory_space<vmem>>, %arg6: memref<128x128xbf16, #tpu.memory_space<vmem>>, %arg7: memref<1x128xf32, #tpu.memory_space<vmem>>, %arg8: memref<1x128xf32, #tpu.memory_space<vmem>>, %arg9: memref<8x128xf32, #tpu.memory_space<vmem>>) attributes {dimension_semantics = [#tpu.dimension_semantics<parallel>], iteration_bounds = array<i64: 2>, scalar_prefetch = 0 : i64, scratch_operands = 0 : i64, tpu.core_type = #tpu.core_type<tc>, window_params = [{transform_indices = @transform_0, window_bounds = array<i64: 8, 16>}, {pipeline_mode = #tpu.pipeline_mode<synchronous>, transform_indices = @transform_1, window_bounds = array<i64: 16, 128>}, {pipeline_mode = #tpu.pipeline_mode<synchronous>, transform_indices = @transform_2, window_bounds = array<i64: 1, 128>}, {pipeline_mode = #tpu.pipeline_mode<synchronous>, transform_indices = @transform_3, window_bounds = array<i64: 128, 128>}, {pipeline_mode = #tpu.pipeline_mode<synchronous>, transform_indices = @transform_4, window_bounds = array<i64: 1, 128>}, {pipeline_mode = #tpu.pipeline_mode<synchronous>, transform_indices = @transform_5, window_bounds = array<i64: 128, 128>}, {pipeline_mode = #tpu.pipeline_mode<synchronous>, transform_indices = @transform_6, window_bounds = array<i64: 1, 128>}, {pipeline_mode = #tpu.pipeline_mode<synchronous>, transform_indices = @transform_7, window_bounds = array<i64: 1, 128>}, {transform_indices = @transform_8, window_bounds = array<i64: 8, 128>}]} {
    %c0 = arith.constant 0 : index
    %c0_0 = arith.constant 0 : index
    %0 = vector.load %arg1[%c0, %c0_0] : memref<8x16xbf16, #tpu.memory_space<vmem>>, vector<8x16xbf16>
    %c0_1 = arith.constant 0 : index
    %c0_2 = arith.constant 0 : index
    %1 = vector.load %arg2[%c0_1, %c0_2] : memref<16x128xbf16, #tpu.memory_space<vmem>>, vector<16x128xbf16>
    %cst = arith.constant dense<0.000000e+00> : vector<8x128xf32>
    %2 = tpu.matmul %0, %1, %cst {dimension_numbers = #tpu.dot_dimension_numbers<[1], [0], [0], [1], [0, 0, 1, 1], [], []>} : vector<8x16xbf16>, vector<16x128xbf16>, vector<8x128xf32> -> vector<8x128xf32>
    %c0_3 = arith.constant 0 : index
    %c0_4 = arith.constant 0 : index
    %3 = vector.load %arg3[%c0_3, %c0_4] : memref<1x128xf32, #tpu.memory_space<vmem>>, vector<1x128xf32>
    %4 = vector.broadcast %3 : vector<1x128xf32> to vector<8x128xf32>
    %5 = arith.addf %2, %4 : vector<8x128xf32>
    %cst_5 = arith.constant 0.000000e+00 : f32
    %6 = vector.broadcast %cst_5 : f32 to vector<8x128xf32>
    %7 = arith.maximumf %5, %6 : vector<8x128xf32>
    %8 = arith.truncf %7 : vector<8x128xf32> to vector<8x128xbf16>
    %c0_6 = arith.constant 0 : index
    %c0_7 = arith.constant 0 : index
    %9 = vector.load %arg4[%c0_6, %c0_7] : memref<128x128xbf16, #tpu.memory_space<vmem>>, vector<128x128xbf16>
    %cst_8 = arith.constant dense<0.000000e+00> : vector<8x128xf32>
    %10 = tpu.matmul %8, %9, %cst_8 {dimension_numbers = #tpu.dot_dimension_numbers<[1], [0], [0], [1], [0, 0, 1, 1], [], []>} : vector<8x128xbf16>, vector<128x128xbf16>, vector<8x128xf32> -> vector<8x128xf32>
    %c0_9 = arith.constant 0 : index
    %c0_10 = arith.constant 0 : index
    %11 = vector.load %arg5[%c0_9, %c0_10] : memref<1x128xf32, #tpu.memory_space<vmem>>, vector<1x128xf32>
    %12 = vector.broadcast %11 : vector<1x128xf32> to vector<8x128xf32>
    %13 = arith.addf %10, %12 : vector<8x128xf32>
    %cst_11 = arith.constant 0.000000e+00 : f32
    %14 = vector.broadcast %cst_11 : f32 to vector<8x128xf32>
    %15 = arith.maximumf %13, %14 : vector<8x128xf32>
    %16 = arith.truncf %15 : vector<8x128xf32> to vector<8x128xbf16>
    %c0_12 = arith.constant 0 : index
    %c0_13 = arith.constant 0 : index
    %17 = vector.load %arg6[%c0_12, %c0_13] : memref<128x128xbf16, #tpu.memory_space<vmem>>, vector<128x128xbf16>
    %cst_14 = arith.constant dense<0.000000e+00> : vector<8x128xf32>
    %18 = tpu.matmul %16, %17, %cst_14 {dimension_numbers = #tpu.dot_dimension_numbers<[1], [0], [0], [1], [0, 0, 1, 1], [], []>} : vector<8x128xbf16>, vector<128x128xbf16>, vector<8x128xf32> -> vector<8x128xf32>
    %c0_15 = arith.constant 0 : index
    %c0_16 = arith.constant 0 : index
    %19 = vector.load %arg7[%c0_15, %c0_16] : memref<1x128xf32, #tpu.memory_space<vmem>>, vector<1x128xf32>
    %20 = vector.broadcast %19 : vector<1x128xf32> to vector<8x128xf32>
    %21 = arith.addf %18, %20 : vector<8x128xf32>
    %22 = math.tanh %21 : vector<8x128xf32>
    %c0_17 = arith.constant 0 : index
    %c0_18 = arith.constant 0 : index
    %23 = vector.load %arg8[%c0_17, %c0_18] : memref<1x128xf32, #tpu.memory_space<vmem>>, vector<1x128xf32>
    %24 = arith.subf %21, %22 : vector<8x128xf32>
    %25 = vector.broadcast %23 : vector<1x128xf32> to vector<8x128xf32>
    %26 = arith.mulf %25, %24 : vector<8x128xf32>
    %27 = arith.addf %22, %26 : vector<8x128xf32>
    %c0_19 = arith.constant 0 : index
    %c0_20 = arith.constant 0 : index
    %28 = vector.load %arg9[%c0_19, %c0_20] : memref<8x128xf32, #tpu.memory_space<vmem>>, vector<8x128xf32>
    tpu.vector_store %arg9[%c0_19, %c0_20], %27 {strides = array<i32>} : memref<8x128xf32, #tpu.memory_space<vmem>>, vector<8x128xf32>,
    return
  }
  func.func @transform_0(%arg0: i32) -> (i32, i32) {
    %c0_i32 = arith.constant 0 : i32
    %c0_i32_0 = arith.constant 0 : i32
    return %arg0, %c0_i32 : i32, i32
  }
  func.func @transform_1(%arg0: i32) -> (i32, i32) {
    %c0_i32 = arith.constant 0 : i32
    %c0_i32_0 = arith.constant 0 : i32
    %c0_i32_1 = arith.constant 0 : i32
    return %c0_i32, %c0_i32_0 : i32, i32
  }
  func.func @transform_2(%arg0: i32) -> (i32, i32) {
    %c0_i32 = arith.constant 0 : i32
    %c0_i32_0 = arith.constant 0 : i32
    %c0_i32_1 = arith.constant 0 : i32
    return %c0_i32, %c0_i32_0 : i32, i32
  }
  func.func @transform_3(%arg0: i32) -> (i32, i32) {
    %c0_i32 = arith.constant 0 : i32
    %c0_i32_0 = arith.constant 0 : i32
    %c0_i32_1 = arith.constant 0 : i32
    return %c0_i32, %c0_i32_0 : i32, i32
  }
  func.func @transform_4(%arg0: i32) -> (i32, i32) {
    %c0_i32 = arith.constant 0 : i32
    %c0_i32_0 = arith.constant 0 : i32
    %c0_i32_1 = arith.constant 0 : i32
    return %c0_i32, %c0_i32_0 : i32, i32
  }
  func.func @transform_5(%arg0: i32) -> (i32, i32) {
    %c0_i32 = arith.constant 0 : i32
    %c0_i32_0 = arith.constant 0 : i32
    %c0_i32_1 = arith.constant 0 : i32
    return %c0_i32, %c0_i32_0 : i32, i32
  }
  func.func @transform_6(%arg0: i32) -> (i32, i32) {
    %c0_i32 = arith.constant 0 : i32
    %c0_i32_0 = arith.constant 0 : i32
    %c0_i32_1 = arith.constant 0 : i32
    return %c0_i32, %c0_i32_0 : i32, i32
  }
  func.func @transform_7(%arg0: i32) -> (i32, i32) {
    %c0_i32 = arith.constant 0 : i32
    %c0_i32_0 = arith.constant 0 : i32
    %c0_i32_1 = arith.constant 0 : i32
    return %c0_i32, %c0_i32_0 : i32, i32
  }
  func.func @transform_8(%arg0: i32) -> (i32, i32) {
    %c0_i32 = arith.constant 0 : i32
    %c0_i32_0 = arith.constant 0 : i32
    return %arg0, %c0_i32 : i32, i32
  }
}

</mosaic_0001>

<bundles_post_ra>
// kernel: tpu_custom_call.1
= control target key start
LH: loop header
LB: loop body
LE: loop exit
PB: predicated region body
PF: predicated region fallthrough
CT: control target
= control target key end

     0   :  { %s1427_s0 = inlined_call_operand.hbm [shape: bf16[16,16], index: 0, kind: input, shape index: {}]   ;;  %s1428_s1 = inlined_call_operand.hbm [shape: bf16[16,128], index: 1, kind: input, shape index: {}]   ;;  %s1429_s2 = inlined_call_operand.vmem [shape: f32[1,128], index: 2, kind: input, shape index: {}]   ;;  %s1430_s3 = inlined_call_operand.hbm [shape: bf16[128,128], index: 3, kind: input, shape index: {}]   ;;  %s1431_s4 = inlined_call_operand.vmem [shape: f32[1,128], index: 4, kind: input, shape index: {}]   ;;  %s1432_s5 = inlined_call_operand.hbm [shape: bf16[128,128], index: 5, kind: input, shape index: {}]   ;;  %s1433_s6 = inlined_call_operand.vmem [shape: f32[1,128], index: 6, kind: input, shape index: {}]   ;;  %s1434_s7 = inlined_call_operand.vmem [shape: f32[1,128], index: 7, kind: input, shape index: {}]   ;;  %s1435_s8 = inlined_call_operand.hbm [shape: f32[16,128], index: 8, kind: output, shape index: {}]  }
   0x1   :  { %1440 = sst [smem:[#allocation15_spill]] %s1428_s1 }
   0x2   :  { %1441 = sst [smem:[#allocation16_spill]] %s1430_s3 }
   0x3   :  { %1442 = sst [smem:[#allocation17_spill]] %s1432_s5 }
   0x4   :  { %13 = vsyncpa [#allocation3], 0 }
   0x5   :  { %15 = vsyncpa [#allocation3 + $0x1], 0 }
   0x6   :  { %16 = vsyncpa [#allocation6], 0 }
   0x7   :  { %17 = vsyncpa [#allocation9], 0 }
   0x8   :  { %18 = vsyncpa [#allocation4], 0 }
   0x9   :  { %20 = vsyncpa [#allocation4 + $0x1], 0  ;;  %s1217_s27 = smov 0   ;;  %s1219_s28 = smov 0  }
   0xa   :  { %s1221_s29 = smov 0   ;;  %s1223_s30 = smov 0  }
   0xb LB: > { %s1238_s9 = sadd.s32 4294967295, %s1161_s30   ;;  %s777_s10 = sadd.s32 4294967294, %s1161_s30   ;;  %s1161_s30 = sphi %s1223_s30, %s1465_s30   ;;  %s1157_s29 = sphi %s1221_s29, %s1464_s29   ;;  %s1153_s28 = sphi %s1219_s28, %s1463_s28   ;;  %s1149_s27 = sphi %s1217_s27, %s1462_s27  }
   0xc   : > { %p46_p0 = scmp.ne.s32.totalorder %s1153_s28, %s1149_s27  ;;  %p1436_p1 = scmp.eq.s32.totalorder %s1238_s9, 0 }
   0xd   : > { %p223_p3 = scmp.eq.s32.totalorder %s777_s10, 1  ;;  %p778_p5 = scmp.ge.s32.totalorder %s1161_s30, 1 }
   0xe   : > { %p1247_p4 = por %p1436_p1, %p46_p0  ;;  %p230_p7 = scmp.lt.s32.totalorder %s1161_s30, 3 }
   0xf   : > { %p1252_p6 = por %p223_p3, %p46_p0  ;;  %s1163_s14 = smov [#allocation5]  }
  0x10   : > { %s1443_s11 = scalar_select %p1247_p4, 1, 0 }
  0x11   : > { %s1444_s12 = scalar_select %p1252_p6, 1, 0 }
  0x12   : > { %p1257_p8 = pnand %p778_p5, %p230_p7  ;;  %s242_s15 = sshll.u32 %s1163_s14, 4  ;;  %s243_s15 = int_to_ptr.vmem [resolvable:$true] %s242_s15 }
  0x13   : > { %s1164_s17 = smov [#allocation7]   ;;  %s1165_s19 = smov [#allocation8]  }
  0x14   : > { %s1445_s13 = scalar_select %p1257_p8, 1, 0 }
  0x15   : > { %p899_p9 = pneg %p1257_p8  ;;  %s258_s18 = sshll.u32 %s1164_s17, 4  ;;  %s259_s18 = int_to_ptr.vmem [resolvable:$true] %s258_s18 }
  0x16   : > { %s274_s20 = sshll.u32 %s1165_s19, 4  ;;  %s994_s21 = scalar_lea.vmem %s243_s15, 128  ;;  %s275_s20 = int_to_ptr.vmem [resolvable:$true] %s274_s20 }
  0x17   : > { %p1266_p11 = pnand %p899_p9, %p1436_p1  ;;  %p995_p13 = scmp.ne.s32.totalorder %s243_s15, %s994_s21 }
  0x18   : > { %p1002_p5 = scmp.lt.s32.totalorder %s243_s15, %s243_s15  ;;  %p1003_p7 = scmp.lt.s32.totalorder %s994_s21, %s994_s21 }
  0x19   : > { %p985_p12 = pneg %p1266_p11 }
  0x1a   : > { %p1004_p9 = por %p1003_p7, %p1002_p5 }
  0x1b   : > { %p997_p0 = pnand %p995_p13, %p985_p12 }
  0x1d   : > { %p998_p3 = pneg %p997_p0 }
  0x1f   : > { %p1005_p10 = pnand %p1004_p9, %p998_p3 }
  0x21   : > { %1008 = shalt.err (!%p1005_p10)
}
  0x22   : > { %s1166_s22 = smov 64   ;;  %s1167_s23 = smov 4  }
  0x23   : > { %s1447_s1 = sld [smem:[#allocation15_spill]]  ;;  %s1020_s26 = scalar_lea.vmem %s259_s18, 1024 }
  0x24   : > { %p1021_p1 = scmp.ne.s32.totalorder %s259_s18, %s1020_s26  ;;  %p1028_p2 = scmp.lt.s32.totalorder %s259_s18, %s259_s18 }
  0x25   : > { %p1029_p6 = scmp.lt.s32.totalorder %s1020_s26, %s1020_s26 }
  0x26   : > { %p1023_p13 = pnand %p1021_p1, %p985_p12 }
  0x27   : > { %p1030_p5 = por %p1029_p6, %p1028_p2 }
  0x28   : > { %p1024_p0 = pneg %p1023_p13 }
  0x29   : > { %902 = dma.hbm_to_vmem [thread:$0]  (!%p1266_p11), %s1447_s1, 128, %s243_s15, [#allocation6], %s1166_s22, %s1166_s22, %s1167_s23  }
  0x2a   : > { %p1031_p3 = pnand %p1030_p5, %p1024_p0 }
  0x2c   : > { %1034 = shalt.err (!%p1031_p3)
}
  0x2d   : > { %s1448_s3 = sld [smem:[#allocation16_spill]]  ;;  %s1046_s15 = scalar_lea.vmem %s275_s20, 1024 }
  0x2e   : > { %p1047_p10 = scmp.ne.s32.totalorder %s275_s20, %s1046_s15  ;;  %p1054_p9 = scmp.lt.s32.totalorder %s275_s20, %s275_s20 }
  0x2f   : > { %p1055_p13 = scmp.lt.s32.totalorder %s1046_s15, %s1046_s15 }
  0x30   : > { %p1049_p7 = pnand %p1047_p10, %p985_p12 }
  0x31   : > { %p1056_p4 = por %p1055_p13, %p1054_p9 }
  0x32   : > { %p1050_p1 = pneg %p1049_p7 }
  0x33   : > { %905 = dma.hbm_to_vmem [thread:$0]  (!%p1266_p11), %s1448_s3, 1024, %s259_s18, [#allocation6], %s1166_s22, %s1166_s22, %s1167_s23  }
  0x34   : > { %p1057_p2 = pnand %p1056_p4, %p1050_p1 }
  0x36   : > { %1060 = shalt.err (!%p1057_p2)
}
  0x37   : > { %s1449_s5 = sld [smem:[#allocation17_spill]]  ;;  %s1297_s18 = sadd.s32 1, %s1161_s30  }
  0x38   : > { %s30_s21 = ssub.s32 %s1161_s30, %s1297_s18  ;;  %s33_s16 = sadd.s32 1, %s1157_s29 }
  0x39   : > { %p31_p4 = scmp.eq.s32.totalorder %s30_s21, 0  ;;  %p40_p6 = scmp.ne.s32.totalorder %s1157_s29, %s1153_s28 }
  0x3a   : > { %p41_p12 = scmp.eq.s32.totalorder %s1161_s30, 0  ;;  %p920_p0 = scmp.lt.s32.totalorder %s1161_s30, 2 }
  0x3b   : > { %s1307_s24 = scalar_select %p31_p4, %s1157_s29, %s33_s16  }
  0x3c   : > { %p42_p5 = por %p41_p12, %p40_p6  ;;  %p1450_p3 = scmp.eq.s32.totalorder %s1238_s9, 1 }
  0x3d   : > { %908 = dma.hbm_to_vmem [thread:$0]  (!%p1266_p11), %s1449_s5, 1024, %s275_s20, [#allocation9], %s1166_s22, %s1166_s22, %s1167_s23  }
  0x3e   : > { %p1311_p10 = por %p1450_p3, %p40_p6  ;;  %s294_s26 = sand.u32 1, %s1157_s29  }
  0x3f   : > { %s784_s10 = sshll.u32 %s1161_s30, 6  ;;  %s783_s20 = sshll.u32 %s294_s26, 2 }
  0x40   : > { %s1451_s25 = scalar_select %p1311_p10, 1, 0 }
  0x41   : > { %s1320_s14 = scalar_lea.hbm %s1427_s0, %s784_s10  ;;  %s298_s15 = scalar_lea.vmem [#allocation2], %s783_s20 }
  0x42   : > { %s305_s17 = sshll.u32 %s298_s15, 4  ;;  %p1322_p11 = pnand %p920_p0, %p42_p5  ;;  %s306_s17 = int_to_ptr.vmem [resolvable:$true] %s305_s17 }
  0x43   : > { %s295_s21 = scalar_lea.sflag [#allocation3], %s294_s26  ;;  %s1061_s16 = scalar_lea.hbm %s1320_s14, 64 }
  0x44   : > { %p1062_p7 = scmp.ne.s32.totalorder %s1320_s14, %s1061_s16  ;;  %p1063_p1 = pneg %p1322_p11 }
  0x45   : > { %s1066_s23 = scalar_lea.hbm %s1427_s0, 128  ;;  %p1067_p2 = scmp.lt.s32.totalorder %s1320_s14, %s1427_s0 }
  0x46   : > { %p1064_p9 = pnand %p1063_p1, %p1062_p7  ;;  %p1068_p4 = scmp.lt.s32.totalorder %s1066_s23, %s1061_s16 }
  0x48   : > { %p1065_p13 = pneg %p1064_p9  ;;  %p1069_p6 = por %p1068_p4, %p1067_p2 }
  0x4a   : > { %p1070_p12 = pnand %p1069_p6, %p1065_p13 }
  0x4c   : > { %1073 = shalt.err (!%p1070_p12)
}
  0x4d   : > { %s1074_s15 = scalar_lea.vmem %s306_s17, 64  ;;  %s1168_s26 = smov [#allocation2]  }
  0x4e   : > { %p1075_p0 = scmp.ne.s32.totalorder %s306_s17, %s1074_s15  ;;  %s1079_s3 = sshll.u32 %s1168_s26, 4  ;;  %s1080_s3 = int_to_ptr.vmem [resolvable:$false] %s1079_s3 }
  0x4f   : > { %s1081_s5 = scalar_lea.vmem %s1080_s3, 128  ;;  %p1082_p7 = scmp.lt.s32.totalorder %s306_s17, %s1080_s3 }
  0x50   : > { %p1077_p5 = pnand %p1075_p0, %p1063_p1  ;;  %p1083_p9 = scmp.lt.s32.totalorder %s1081_s5, %s1074_s15 }
  0x52   : > { %p1078_p3 = pneg %p1077_p5  ;;  %p1084_p10 = por %p1083_p9, %p1082_p7 }
  0x54   : > { %p1085_p8 = pnand %p1084_p10, %p1078_p3 }
  0x56   : > { %1088 = shalt.err (!%p1085_p8)
}
  0x57   : > { %912 = dma.hbm_to_vmem [thread:$0]  (!%p1322_p11), %s1320_s14, 64, %s306_s17, %s295_s21  }
  0x58   : > { %p1453_p13 = scmp.ne.s32.totalorder %s1445_s13, 0 }
  0x59   : > { %s1343_s1 = sand.u32 (!%p1453_p13), 1, %s1153_s28   ;;  %p1454_p1 = scmp.ne.s32.totalorder (!%p1453_p13), %s1443_s11, 0 }
  0x5a   : > { %314 = sbr.rel (%p1453_p13) target bundleno = 734 (0x2de), region = 52  ;;  %s786_s16 = sshll.u32 (!%p1453_p13), %s1343_s1, 2 }
  0x5b   : > { %s317_s10 = scalar_lea.sflag (!%p1453_p13), [#allocation3], %s1343_s1  ;;  %s320_s3 = scalar_lea.vmem (!%p1453_p13), [#allocation2], %s786_s16 }
  0x5f   : > { %1132 = dma.done.wait (%p1454_p1), %s317_s10, 64  }
  0x60   : > { %1134 = vsyncadd (%p1454_p1), %s317_s10, 4294967232  ;;  %p1455_p8 = scmp.eq.s32.totalorder %s1238_s9, 0 }
  0x62   : > { %1136 = dma.done.wait (%p1455_p8), [#allocation6], 1152   ;;  %p1456_p10 = pmov %p1455_p8 }
  0x63   : > { %p1457_p11 = pmov %p1455_p8 }
  0x64   : > { %1138 = vsyncadd (%p1456_p10), [#allocation6], 4294966144 }
  0x65   : > { %1140 = dma.done.wait (%p1457_p11), [#allocation9], 1024   ;;  %p1458_p2 = pmov %p1455_p8 }
  0x66   : > { %v1169_v0 = vmov 0.0   ;;  %vm1170_vm0 = vmmov 0   ;;  %v964_v1 = vld [vmem:[#allocation5] sm:$0xff]   ;;  %v366_v2 = vld [vmem:[%s320_s3] sm:$0xf]  ;;  %vm382_vm1 = vcmask 130048  }
  0x67   : > { %1142 = vsyncadd (%p1458_p2), [#allocation9], 4294966272  ;;  %837 = vmatprep.subr.bf16.mxu0 %v1169_v0  ;;  %839 = vmatprep.mubr.msk.bf16.mxu0 %vm1170_vm0, %v1169_v0  ;;  %v965_v3 = vld [vmem:[#allocation7 + $0x38] sm:$0xff]   ;;  %v966_v4 = vld [vmem:[#allocation7 + $0x30] sm:$0xff]   ;;  %s790_s21 = sshll.u32 %s1343_s1, 3  ;;  %s814_s20 = sshll.u32 %s1238_s9, 7 }
  0x68   : > { %843 = vmatprep.subr.bf16.mxu1 %v1169_v0  ;;  %859 = vmatprep.mubr.msk.bf16.mxu1 %vm1170_vm0, %v1169_v0  ;;  %v967_v5 = vld [vmem:[#allocation7 + $0x28] sm:$0xff]   ;;  %v968_v6 = vld [vmem:[#allocation7 + $0x20] sm:$0xff]   ;;  %v969_v7 = vld [vmem:[#allocation7 + $0x18] sm:$0xff]   ;;  %s364_s15 = scalar_lea.vmem [#allocation10], %s790_s21  ;;  %s676_s3 = scalar_lea.hbm %s1435_s8, %s814_s20 }
  0x69   : > { %838 = vmatpush3.bf16.msra.mxu0 %v964_v1  ;;  %844 = vmatpush3.bf16.msra.mxu1 %v965_v3  ;;  %v970_v8 = vld [vmem:[#allocation7 + $0x10] sm:$0xff]   ;;  %v971_v9 = vld [vmem:[#allocation7 + $0x8] sm:$0xff]   ;;  %v972_v10 = vld [vmem:[#allocation7] sm:$0xff]   ;;  %s678_s26 = sshll.u32 %s364_s15, 4  ;;  %s665_s5 = scalar_lea.sflag [#allocation4], %s1343_s1  ;;  %s679_s26 = int_to_ptr.vmem [resolvable:$true] %s678_s26 }
  0x6a   : > { %863 = vmatprep.subr.bf16.mxu0 %v1169_v0  ;;  %845 = vmatprep.subr.bf16.mxu1 %v1169_v0  ;;  %v973_v11 = vld [vmem:[#allocation8 + $0x38] sm:$0xff]   ;;  %v974_v12 = vld [vmem:[#allocation8 + $0x30] sm:$0xff]   ;;  %v975_v13 = vld [vmem:[#allocation8 + $0x28] sm:$0xff]   ;;  %s1089_s11 = scalar_lea.vmem %s679_s26, 128  ;;  %p1459_p6 = scmp.ne.s32.totalorder %s1451_s25, 0 }
  0x6b   : > { %v976_v14 = vld [vmem:[#allocation8 + $0x20] sm:$0xff]   ;;  %v977_v15 = vld [vmem:[#allocation8 + $0x18] sm:$0xff]   ;;  %v978_v16 = vld [vmem:[#allocation8 + $0x10] sm:$0xff]   ;;  %p1090_p4 = scmp.ne.s32.totalorder %s679_s26, %s1089_s11  ;;  %s1171_s13 = smov [#allocation10]  }
  0x6c   : > { %840 = vmatmul.mubr.msk.bf16.vlgmr.msra.gmra.mxu0 %vm382_vm1, %v366_v2  ;;  %v791_v17 = vld [vmem:[%s1429_s2] ss:$0 sm:$0xff]  ;;  %v979_v25 = vld [vmem:[#allocation8 + $0x8] sm:$0xff]   ;;  %v980_v26 = vld [vmem:[#allocation8] sm:$0xff]   ;;  %s1093_s14 = sshll.u32 %s1171_s13, 4  ;;  %s1094_s14 = int_to_ptr.vmem [resolvable:$false] %s1093_s14 }
  0x6d   : > { %879 = vmatprep.mubr.msk.bf16.mxu0 %vm1170_vm0, %v1169_v0  ;;  %846 = vmatpush3.bf16.msra.mxu1 %v966_v4  ;;  %v794_v27 = vld [vmem:[%s1431_s4] ss:$0 sm:$0xff]  ;;  %p1091_p12 = pnand %p1090_p4, %p1459_p6  ;;  %s1095_s9 = scalar_lea.vmem %s1094_s14, 256 }
  0x6e   : > { %847 = vmatprep.subr.bf16.mxu1 %v1169_v0  ;;  %864 = vmatpush3.bf16.msra.mxu0 %v973_v11  ;;  %v803_v35 = vld [vmem:[%s1433_s6] ss:$0 sm:$0xff]  ;;  %p1096_p5 = scmp.lt.s32.totalorder %s679_s26, %s1094_s14  ;;  %p1097_p3 = scmp.lt.s32.totalorder %s1095_s9, %s1089_s11 }
  0x6f   : > { %865 = vmatprep.subr.bf16.mxu0 %v1169_v0  ;;  %v812_v42 = vld [vmem:[%s1434_s7] ss:$0 sm:$0xff]  ;;  %p1092_p0 = pneg %p1091_p12 }
  0x70   : > { %p1098_p7 = por %p1097_p3, %p1096_p5 }
  0x71   : > { %848 = vmatpush3.bf16.msra.mxu1 %v967_v5 }
  0x72   : > { %849 = vmatprep.subr.bf16.mxu1 %v1169_v0  ;;  %866 = vmatpush3.bf16.msra.mxu0 %v974_v12  ;;  %p1099_p9 = pnand %p1098_p7, %p1092_p0 }
  0x73   : > { %867 = vmatprep.subr.bf16.mxu0 %v1169_v0 }
  0x75   : > { %850 = vmatpush3.bf16.msra.mxu1 %v968_v6 }
  0x76   : > { %851 = vmatprep.subr.bf16.mxu1 %v1169_v0  ;;  %868 = vmatpush3.bf16.msra.mxu0 %v975_v13 }
  0x77   : > { %869 = vmatprep.subr.bf16.mxu0 %v1169_v0 }
  0x79   : > { %852 = vmatpush3.bf16.msra.mxu1 %v969_v7 }
  0x7a   : > { %853 = vmatprep.subr.bf16.mxu1 %v1169_v0  ;;  %870 = vmatpush3.bf16.msra.mxu0 %v976_v14 }
  0x7b   : > { %871 = vmatprep.subr.bf16.mxu0 %v1169_v0 }
  0x7d   : > { %854 = vmatpush3.bf16.msra.mxu1 %v970_v8 }
  0x7e   : > { %855 = vmatprep.subr.bf16.mxu1 %v1169_v0  ;;  %872 = vmatpush3.bf16.msra.mxu0 %v977_v15 }
  0x7f   : > { %873 = vmatprep.subr.bf16.mxu0 %v1169_v0 }
  0x81   : > { %856 = vmatpush3.bf16.msra.mxu1 %v971_v9 }
  0x82   : > { %857 = vmatprep.subr.bf16.mxu1 %v1169_v0  ;;  %874 = vmatpush3.bf16.msra.mxu0 %v978_v16 }
  0x83   : > { %875 = vmatprep.subr.bf16.mxu0 %v1169_v0 }
  0x85   : > { %858 = vmatpush3.bf16.msra.mxu1 %v972_v10 }
  0x86   : > { %876 = vmatpush3.bf16.msra.mxu0 %v979_v25 }
  0x87   : > { %877 = vmatprep.subr.bf16.mxu0 %v1169_v0 }
  0x8a   : > { %878 = vmatpush3.bf16.msra.mxu0 %v980_v26 }
 0x12c   : > { %v420_v18 = vpop.f32.mrf.mxu0 }
 0x12d   : > { %v421_v19 = vadd.f32 %v791_v17, %v420_v18 }
 0x12e   : > { %v841_v20 = vpop.f32.mrf.mxu0 }
 0x12f   : > { %v426_v21 = vmax.f32 %v421_v19, 0.0 }
 0x130   : > { %v423_v22 = vpop.f32.mrf.mxu0 }
 0x131   : > { %v427_v23 = vpack.c.bf16 %v426_v21, %v426_v21 }
 0x132   : > { %v842_v24 = vpop.f32.mrf.mxu0 }
 0x133   : > { %860 = vmatmul.mubr.bf16.vlgmr.msra.gmra.mxu1 %v427_v23 }
 0x1f3   : > { %v533_v28 = vpop.f32.mrf.mxu1 }
 0x1f4   : > { %v534_v29 = vadd.f32 %v794_v27, %v533_v28 }
 0x1f5   : > { %v861_v30 = vpop.f32.mrf.mxu1 }
 0x1f6   : > { %v539_v31 = vmax.f32 %v534_v29, 0.0 }
 0x1f7   : > { %v536_v32 = vpop.f32.mrf.mxu1 }
 0x1f8   : > { %v540_v33 = vpack.c.bf16 %v539_v31, %v539_v31 }
 0x1f9   : > { %v862_v34 = vpop.f32.mrf.mxu1 }
 0x1fa   : > { %880 = vmatmul.mubr.bf16.vlgmr.msra.gmra.mxu0 %v540_v33 }
 0x2ba   : > { %v646_v36 = vpop.f32.mrf.mxu0 }
 0x2bb   : > { %v647_v37 = vadd.f32 %v803_v35, %v646_v36 }
 0x2bc   : > { %v881_v38 = vpop.f32.mrf.mxu0 }
 0x2bd   : > { %981 = vtanh.f32 %v647_v37 }
 0x2be   : > { %v649_v39 = vpop.f32.mrf.mxu0 }
 0x2c0   : > { %v882_v40 = vpop.f32.mrf.mxu0 }
 0x2ca   : > { %v982_v41 = vpop.eup %981 }
 0x2cb   : > { %v654_v43 = vsub.f32 %v647_v37, %v982_v41 }
 0x2cd   : > { %v661_v44 = vmul.f32 %v812_v42, %v654_v43 }
 0x2cf   : > { %v662_v45 = vadd.f32 %v982_v41, %v661_v44 }
 0x2d1   : > { %663 = vst [vmem:[%s364_s15] sm:$0xff] %v662_v45 }
 0x2d2   : > { %1102 = shalt.err (!%p1099_p9)
}
 0x2d3   : > { %s1103_s17 = scalar_lea.hbm %s676_s3, 128  ;;  %s1107_s21 = scalar_lea.hbm %s1435_s8, 256 }
 0x2d4   : > { %p1104_p13 = scmp.ne.s32.totalorder %s676_s3, %s1103_s17  ;;  %p1108_p10 = scmp.lt.s32.totalorder %s676_s3, %s1435_s8 }
 0x2d5   : > { %p1109_p11 = scmp.lt.s32.totalorder %s1107_s21, %s1103_s17 }
 0x2d6   : > { %p1105_p1 = pnand %p1104_p13, %p1459_p6 }
 0x2d7   : > { %p1110_p2 = por %p1109_p11, %p1108_p10 }
 0x2d8   : > { %p1106_p8 = pneg %p1105_p1 }
 0x2da   : > { %p1111_p4 = pnand %p1110_p2, %p1106_p8 }
 0x2dc   : > { %1114 = shalt.err (!%p1111_p4)
}
 0x2dd   : > { %897 = dma.vmem_to_hbm [thread:$0]  (%p1459_p6), %s679_s26, 128, %s676_s3, %s665_s5  }
 0x2de PF: > { %s690_s20 = sand.u32 1, %s1149_s27   ;;  %p1460_p12 = scmp.ne.s32.totalorder %s1444_s12, 0 }
 0x2df   : > { %p1461_p0 = scmp.ge.s32.totalorder %s1161_s30, 2  ;;  %s691_s15 = scalar_lea.sflag [#allocation4], %s690_s20 }
 0x2e1   : > { %p914_p5 = pnand %p1461_p0, %p1460_p12 }
 0x2e3   : > { %p915_p3 = pneg %p914_p5 }
 0x2e5   : > { %1144 = dma.done.wait (%p915_p3), %s691_s15, 128  }
 0x2e6   : > { %1146 = vsyncadd (%p915_p3), %s691_s15, 4294967168  ;;  %p23_p7 = scmp.ge.s32.totalorder %s1297_s18, 4   ;;  %s1462_s27 = smov %s1153_s28 }
 0x2e7   : > { %s1463_s28 = smov %s1157_s29  ;;  %s1464_s29 = smov %s1307_s24 }
 0x2e8   : > { %s1465_s30 = smov %s1297_s18  ;;  %25 = sbr.rel (!%p23_p7) target bundleno = 11 (0xb), region = 109 }
 0x2ed   :  { %696 = vsyncpa [#allocation3], 1 }
 0x2ee   :  { %698 = vsyncpa [#allocation3 + $0x1], 1 }
 0x2ef   :  { %699 = vsyncpa [#allocation6], 1 }
 0x2f0   :  { %700 = vsyncpa [#allocation9], 1 }
 0x2f1   :  { %701 = vsyncpa [#allocation4], 1 }
 0x2f2   :  { %703 = vsyncpa [#allocation4 + $0x1], 1 }

</bundles_post_ra>
